<compile_context>
chip_gen: v7x
topology: tpu7x:2x2x1
jax: 0.10.0
libtpu: 0.0.40
codegen_flags: <defaults>
</compile_context>

<pallas_src>
import jax
import jax.numpy as jnp
from jax.experimental import pallas as pl
from jax.experimental.pallas import tpu as pltpu

N_INPUT_FEATS = 92     # from Policy.__init__
_MAX_TILE_N = 8192     # rows per tile cap: 4 MiB/buffer f32 (x) + 4 MiB/buffer (out)


def _round_up(x, m):
    return ((x + m - 1) // m) * m


def _pick_tile_n(n):
    """Lane/sublane-friendly row tile (multiple of 128).

    Prefer >=2 grid steps when N is big enough so dimension_semantics
    ("parallel",) can shard rows across TensorCores (v7x), while keeping tiles
    large to amortize per-grid-step overhead.  Capped at 8192 rows.
    """
    n128 = _round_up(max(int(n), 1), 128)
    if n128 <= 256:
        return n128
    half = _round_up((n128 + 1) // 2, 128)
    return int(min(_MAX_TILE_N, max(128, half)))


def _linear_kernel(x_ref, w_ref, b_ref, o_ref):
    # x_ref: (TILE_N, F) VMEM  -- streamed feature tile (native layout, MXU LHS)
    # w_ref: (F, 1)      VMEM  -- weight column, resident across grid steps
    # b_ref: (1, 1)      SMEM  -- scalar bias
    # o_ref: (TILE_N, 1) VMEM  -- per-row logits
    acc = jnp.dot(x_ref[...], w_ref[...], preferred_element_type=jnp.float32)
    o_ref[...] = (acc + b_ref[0, 0]).astype(o_ref.dtype)


def policy_forward(features, weight, bias, *, tile_n=None):
    """features: (N, 92), weight: (1, 92), bias: (1,)  ->  (1, N)."""
    n, f = features.shape
    assert f == N_INPUT_FEATS
    if tile_n is None:
        tile_n = _pick_tile_n(n)
    tile_n = int(tile_n)

    x = features                                   # keep producer dtype (bf16 OK, halves HBM)
    w = weight.reshape(f, 1).astype(x.dtype)       # (1,F)->(F,1): free for a row vector
    b = bias.reshape(1, 1).astype(jnp.float32)     # scalar bias in SMEM

    # TODO(synk): at the real workload (N = O(100)) this matvec is dispatch /
    # step-overhead bound; fuse it into the producer of `features` (or batch
    # many policy evaluations into one pallas_call) rather than launching it
    # standalone.
    out_col = pl.pallas_call(
        _linear_kernel,
        out_shape=jax.ShapeDtypeStruct((n, 1), x.dtype),
        grid_spec=pltpu.PrefetchScalarGridSpec(
            num_scalar_prefetch=0,
            grid=(pl.cdiv(n, tile_n),),
            in_specs=[
                pl.BlockSpec((tile_n, f), lambda i: (i, 0)),        # feature tile (ragged last ok)
                pl.BlockSpec((f, 1), lambda i: (0, 0)),             # weight column, resident
                pl.BlockSpec((1, 1), lambda i: (0, 0),
                             memory_space=pltpu.MemorySpace.SMEM),  # bias scalar
            ],
            out_specs=pl.BlockSpec((tile_n, 1), lambda i: (i, 0)),  # per-row logits
        ),
        compiler_params=pltpu.CompilerParams(
            dimension_semantics=("parallel",),
            vmem_limit_bytes=32 * 1024 * 1024,
        ),
    )(x, w, b)

    # (N, 1) -> (1, N): contiguous data, free reshape in the wrapper.
    return out_col.reshape(1, n)


def init_policy_params(key):
    """Deterministic stand-in for torch orthogonal_ init on a (1, 92) Linear.

    A 1x92 'orthogonal' matrix (gain=1) is just a unit-L2-norm row; bias is 0.
    """
    w = jax.random.normal(key, (1, N_INPUT_FEATS), dtype=jnp.float32)
    w = w / jnp.linalg.norm(w)
    b = jnp.zeros((1,), dtype=jnp.float32)
    return w, b


if __name__ == "__main__":
    key = jax.random.PRNGKey(0)
    k_x, k_w = jax.random.split(key)

    n = 128  # number of candidate variables / rows fed to the policy
    features = jax.random.normal(k_x, (n, N_INPUT_FEATS), dtype=jnp.float32)
    weight, bias = init_policy_params(k_w)

    out = jax.block_until_ready(policy_forward(features, weight, bias))
    ref = (features @ weight.T + bias).reshape(1, -1)
    assert out.shape == (1, n)
    assert jnp.allclose(out, ref, atol=1e-5, rtol=1e-5)

    # Ragged / multi-step-grid paths (no wrapper-side padding anymore).
    for n2 in (200, 1000):
        feats2 = jax.random.normal(jax.random.PRNGKey(n2), (n2, N_INPUT_FEATS), jnp.float32)
        out2 = jax.block_until_ready(policy_forward(feats2, weight, bias))
        ref2 = (feats2 @ weight.T + bias).reshape(1, -1)
        assert out2.shape == (1, n2)
        assert jnp.allclose(out2, ref2, atol=1e-5, rtol=1e-5)

    print("KERNEL_OK")
</pallas_src>

<mosaic_0001>
module attributes {stable_mosaic.version = 11 : i64} {
  func.func @_linear_kernel(%arg0: i32, %arg1: memref<128x92xf32, #tpu.memory_space<vmem>>, %arg2: memref<92x1xf32, #tpu.memory_space<vmem>>, %arg3: memref<1x1xf32, #tpu.memory_space<smem>>, %arg4: memref<128x1xf32, #tpu.memory_space<vmem>>) attributes {dimension_semantics = [#tpu.dimension_semantics<parallel>], iteration_bounds = array<i64: 1>, scalar_prefetch = 0 : i64, scratch_operands = 0 : i64, tpu.core_type = #tpu.core_type<tc>, window_params = [{transform_indices = @transform_0, window_bounds = array<i64: 128, 92>}, {pipeline_mode = #tpu.pipeline_mode<synchronous>, transform_indices = @transform_1, window_bounds = array<i64: 92, 1>}, {transform_indices = @transform_2, window_bounds = array<i64: 1, 1>}, {transform_indices = @transform_3, window_bounds = array<i64: 128, 1>}]} {
    %c0 = arith.constant 0 : index
    %c0_0 = arith.constant 0 : index
    %0 = vector.load %arg1[%c0, %c0_0] : memref<128x92xf32, #tpu.memory_space<vmem>>, vector<128x92xf32>
    %c0_1 = arith.constant 0 : index
    %c0_2 = arith.constant 0 : index
    %1 = vector.load %arg2[%c0_1, %c0_2] : memref<92x1xf32, #tpu.memory_space<vmem>>, vector<92x1xf32>
    %cst = arith.constant dense<0.000000e+00> : vector<128x1xf32>
    %2 = tpu.matmul %0, %1, %cst {dimension_numbers = #tpu.dot_dimension_numbers<[1], [0], [0], [1], [0, 0, 1, 1], [], []>} : vector<128x92xf32>, vector<92x1xf32>, vector<128x1xf32> -> vector<128x1xf32>
    %c0_3 = arith.constant 0 : index
    %c0_4 = arith.constant 0 : index
    %3 = memref.load %arg3[%c0_3, %c0_4] : memref<1x1xf32, #tpu.memory_space<smem>>
    %4 = vector.broadcast %3 : f32 to vector<128x1xf32>
    %5 = arith.addf %2, %4 : vector<128x1xf32>
    %c0_5 = arith.constant 0 : index
    %c0_6 = arith.constant 0 : index
    %6 = vector.load %arg4[%c0_5, %c0_6] : memref<128x1xf32, #tpu.memory_space<vmem>>, vector<128x1xf32>
    tpu.vector_store %arg4[%c0_5, %c0_6], %5 {strides = array<i32>} : memref<128x1xf32, #tpu.memory_space<vmem>>, vector<128x1xf32>,
    return
  }
  func.func @transform_0(%arg0: i32) -> (i32, i32) {
    %c0_i32 = arith.constant 0 : i32
    %c0_i32_0 = arith.constant 0 : i32
    return %arg0, %c0_i32 : i32, i32
  }
  func.func @transform_1(%arg0: i32) -> (i32, i32) {
    %c0_i32 = arith.constant 0 : i32
    %c0_i32_0 = arith.constant 0 : i32
    %c0_i32_1 = arith.constant 0 : i32
    return %c0_i32, %c0_i32_0 : i32, i32
  }
  func.func @transform_2(%arg0: i32) -> (i32, i32) {
    %c0_i32 = arith.constant 0 : i32
    %c0_i32_0 = arith.constant 0 : i32
    %c0_i32_1 = arith.constant 0 : i32
    return %c0_i32, %c0_i32_0 : i32, i32
  }
  func.func @transform_3(%arg0: i32) -> (i32, i32) {
    %c0_i32 = arith.constant 0 : i32
    %c0_i32_0 = arith.constant 0 : i32
    return %arg0, %c0_i32 : i32, i32
  }
}

</mosaic_0001>

<bundles_post_ra>
// kernel: tpu_custom_call.1
= control target key start
LH: loop header
LB: loop body
LE: loop exit
PB: predicated region body
PF: predicated region fallthrough
CT: control target
= control target key end

     0   :  { %vm45_vm0 = vcmask 752640   ;;  %vm94_vm1 = vcmask 1043456   ;;  %vm396_vm2 = vmmov 1   ;;  %vm243_vm4 = vcmask 7168   ;;  %s584_s1 = inlined_call_operand.vmem [shape: f32[92,1], index: 1, kind: input, shape index: {}]   ;;  %s585_s0 = inlined_call_operand.vmem [shape: f32[128,92], index: 0, kind: input, shape index: {}]   ;;  %s586_s2 = inlined_call_operand.<no memory space> [shape: f32[1,1], index: 2, kind: input, shape index: {}]   ;;  %s587_s3 = inlined_call_operand.vmem [shape: f32[128,1], index: 3, kind: output, shape index: {}]  }
   0x1   :  { %v31_v0 = vld [vmem:[%s584_s1] sm:$0xff]  ;;  %v32_v1 = vld [vmem:[%s584_s1 + $0x8] sm:$0xff]  ;;  %v33_v2 = vld [vmem:[%s584_s1 + $0x10] sm:$0xff]  ;;  %v44_v34 = vstv %s586_s2 }
   0x2   :  { %v357_v3 = vpack.c.bf16 %v32_v1, %v31_v0  ;;  %v34_v4 = vld [vmem:[%s584_s1 + $0x18] sm:$0xff]  ;;  %v35_v6 = vld [vmem:[%s584_s1 + $0x20] sm:$0xff]  ;;  %v36_v7 = vld [vmem:[%s584_s1 + $0x28] sm:$0xff] }
   0x3   :  { %v361_v5 = vpack.c.bf16 %v34_v4, %v33_v2  ;;  %v15_v8 = vld [vmem:[%s585_s0] sm:$0xff]  ;;  %v365_v10 = vpack.c.bf16 %v36_v7, %v35_v6  ;;  %v37_v11 = vld [vmem:[%s584_s1 + $0x30] sm:$0xff]  ;;  %v38_v12 = vld [vmem:[%s584_s1 + $0x38] sm:$0xff] }
   0x4   :  { %358 = vmatprep.subr.bf16.mxu0 %v357_v3  ;;  %383 = vmatprep.subr.bf16.mxu1 %v357_v3  ;;  %v23_v9 = vld [vmem:[%s585_s0 + $0x40] sm:$0xff]  ;;  %v369_v13 = vpack.c.bf16 %v38_v12, %v37_v11  ;;  %v40_v15 = vld [vmem:[%s584_s1 + $0x48] sm:$0xff]  ;;  %v41_v17 = vld [vmem:[%s584_s1 + $0x50] sm:$0xff] }
   0x5   :  { %360 = vmatpush3.bf16.msra.mxu0 %v357_v3  ;;  %389 = vmatpush3.bf16.msra.mxu1 %v357_v3  ;;  %v39_v14 = vld [vmem:[%s584_s1 + $0x40] sm:$0xff]  ;;  %v42_v18 = vld [vmem:[%s584_s1 + $0x58] sm:$0xf]  ;;  %vm378_vm3 = vmpackc.low %vm94_vm1, %vm396_vm2 }
   0x6   :  { %362 = vmatprep.subr.bf16.mxu0 %v361_v5  ;;  %384 = vmatprep.subr.bf16.mxu1 %v361_v5  ;;  %v373_v16 = vpack.c.bf16 %v40_v15, %v39_v14  ;;  %v377_v19 = vpack.c.bf16 %v42_v18, %v41_v17  ;;  %v16_v20 = vld [vmem:[%s585_s0 + $0x8] sm:$0xff]  ;;  %v17_v22 = vld [vmem:[%s585_s0 + $0x10] sm:$0xff]  ;;  %v18_v24 = vld [vmem:[%s585_s0 + $0x18] sm:$0xff] }
   0x7   :  { %333 = vmatprep.mubr.msk.f32.mxu0 %vm45_vm0, %v15_v8  ;;  %345 = vmatprep.mubr.msk.f32.mxu1 %vm45_vm0, %v23_v9  ;;  %v24_v21 = vld [vmem:[%s585_s0 + $0x48] sm:$0xff]  ;;  %v25_v23 = vld [vmem:[%s585_s0 + $0x50] sm:$0xff]  ;;  %v26_v25 = vld [vmem:[%s585_s0 + $0x58] sm:$0xff] }
   0x8   :  { %v19_v26 = vld [vmem:[%s585_s0 + $0x20] sm:$0xff]  ;;  %v20_v28 = vld [vmem:[%s585_s0 + $0x28] sm:$0xff]  ;;  %v21_v30 = vld [vmem:[%s585_s0 + $0x30] sm:$0xff] }
   0x9   :  { %364 = vmatpush3.bf16.msra.mxu0 %v361_v5  ;;  %390 = vmatpush3.bf16.msra.mxu1 %v361_v5  ;;  %v27_v27 = vld [vmem:[%s585_s0 + $0x60] sm:$0xff]  ;;  %v28_v29 = vld [vmem:[%s585_s0 + $0x68] sm:$0xff]  ;;  %v29_v31 = vld [vmem:[%s585_s0 + $0x70] sm:$0xff] }
   0xa   :  { %366 = vmatprep.subr.bf16.mxu0 %v365_v10  ;;  %385 = vmatprep.subr.bf16.mxu1 %v365_v10  ;;  %v22_v32 = vld [vmem:[%s585_s0 + $0x38] sm:$0xff] }
   0xb   :  { %v30_v33 = vld [vmem:[%s585_s0 + $0x78] sm:$0xff] }
   0xd   :  { %368 = vmatpush3.bf16.msra.mxu0 %v365_v10  ;;  %391 = vmatpush3.bf16.msra.mxu1 %v365_v10 }
   0xe   :  { %370 = vmatprep.subr.bf16.mxu0 %v369_v13  ;;  %386 = vmatprep.subr.bf16.mxu1 %v369_v13 }
  0x11   :  { %372 = vmatpush3.bf16.msra.mxu0 %v369_v13  ;;  %392 = vmatpush3.bf16.msra.mxu1 %v369_v13 }
  0x12   :  { %374 = vmatprep.subr.bf16.mxu0 %v373_v16  ;;  %387 = vmatprep.subr.bf16.mxu1 %v373_v16 }
  0x15   :  { %376 = vmatpush3.bf16.msra.mxu0 %v373_v16  ;;  %393 = vmatpush3.bf16.msra.mxu1 %v373_v16 }
  0x16   :  { %379 = vmatprep.subr.msk.bf16.mxu0 %vm378_vm3, %v377_v19  ;;  %388 = vmatprep.subr.msk.bf16.mxu1 %vm378_vm3, %v377_v19 }
  0x19   :  { %382 = vmatpush3.bf16.msk.msra.mxu0 %vm378_vm3, %v377_v19  ;;  %394 = vmatpush3.bf16.msk.msra.mxu1 %vm378_vm3, %v377_v19 }
  0x1c   :  { %334 = vmatmul.mubr.msk.f32.vlgmr.msra.gmra.mrb[0].mxu0 %vm45_vm0, %v16_v20  ;;  %346 = vmatmul.mubr.msk.f32.vlgmr.msra.gmra.mrb[0].mxu1 %vm45_vm0, %v24_v21 }
  0x1d   :  { %336 = vmatprep.mubr.msk.f32.mxu0 %vm45_vm0, %v17_v22  ;;  %348 = vmatprep.mubr.msk.f32.mxu1 %vm45_vm0, %v25_v23 }
  0x20   :  { %337 = vmatmul.mubr.msk.f32.gmra.mrb[2].mxu0 %vm45_vm0, %v18_v24  ;;  %349 = vmatmul.mubr.msk.f32.gmra.mrb[2].mxu1 %vm45_vm0, %v26_v25 }
  0x21   :  { %339 = vmatprep.mubr.msk.f32.mxu0 %vm45_vm0, %v19_v26  ;;  %351 = vmatprep.mubr.msk.f32.mxu1 %vm45_vm0, %v27_v27 }
  0x24   :  { %340 = vmatmul.mubr.msk.f32.gmra.mrb[4].mxu0 %vm45_vm0, %v20_v28  ;;  %352 = vmatmul.mubr.msk.f32.gmra.mrb[4].mxu1 %vm45_vm0, %v28_v29 }
  0x25   :  { %342 = vmatprep.mubr.msk.f32.mxu0 %vm45_vm0, %v21_v30  ;;  %354 = vmatprep.mubr.msk.f32.mxu1 %vm45_vm0, %v29_v31 }
  0x28   :  { %343 = vmatmul.mubr.msk.f32.gmra.mrb[6].mxu0 %vm45_vm0, %v22_v32  ;;  %355 = vmatmul.mubr.msk.f32.gmra.mrb[6].mxu1 %vm45_vm0, %v30_v33 }
  0xef   :  { %v335_v35 = vpop.f32.mrb[0].mxu0  ;;  %v347_v36 = vpop.f32.mrb[0].mxu1 }
  0xf0   :  { %v170_v37 = vadd.f32 %v335_v35, %v44_v34  ;;  %v210_v38 = vadd.f32 %v347_v36, %v44_v34  ;;  %v164_v39 = vpop.f32.mrb[1].mxu0  ;;  %v204_v40 = vpop.f32.mrb[1].mxu1 }
  0xf1   :  { %v165_v41 = vadd.f32 %v164_v39, %v44_v34  ;;  %v205_v42 = vadd.f32 %v204_v40, %v44_v34 }
  0xf2   :  { %245 = vst.msk [vmem:[%s587_s3 + $0x8] sm:$0xff] %vm243_vm4, %v170_v37  ;;  %253 = vst.msk [vmem:[%s587_s3 + $0x48] sm:$0xff] %vm243_vm4, %v210_v38 }
  0xf3   :  { %244 = vst.msk [vmem:[%s587_s3] sm:$0xff] %vm243_vm4, %v165_v41  ;;  %252 = vst.msk [vmem:[%s587_s3 + $0x40] sm:$0xff] %vm243_vm4, %v205_v42  ;;  %v338_v43 = vpop.f32.mrb[2].mxu0  ;;  %v350_v44 = vpop.f32.mrb[2].mxu1 }
  0xf4   :  { %v180_v45 = vadd.f32 %v338_v43, %v44_v34  ;;  %v220_v46 = vadd.f32 %v350_v44, %v44_v34  ;;  %v174_v47 = vpop.f32.mrb[3].mxu0  ;;  %v214_v48 = vpop.f32.mrb[3].mxu1 }
  0xf5   :  { %v175_v49 = vadd.f32 %v174_v47, %v44_v34  ;;  %v215_v50 = vadd.f32 %v214_v48, %v44_v34 }
  0xf6   :  { %247 = vst.msk [vmem:[%s587_s3 + $0x18] sm:$0xff] %vm243_vm4, %v180_v45  ;;  %255 = vst.msk [vmem:[%s587_s3 + $0x58] sm:$0xff] %vm243_vm4, %v220_v46 }
  0xf7   :  { %246 = vst.msk [vmem:[%s587_s3 + $0x10] sm:$0xff] %vm243_vm4, %v175_v49  ;;  %254 = vst.msk [vmem:[%s587_s3 + $0x50] sm:$0xff] %vm243_vm4, %v215_v50  ;;  %v341_v51 = vpop.f32.mrb[4].mxu0  ;;  %v353_v52 = vpop.f32.mrb[4].mxu1 }
  0xf8   :  { %v190_v53 = vadd.f32 %v341_v51, %v44_v34  ;;  %v230_v54 = vadd.f32 %v353_v52, %v44_v34  ;;  %v184_v55 = vpop.f32.mrb[5].mxu0  ;;  %v224_v56 = vpop.f32.mrb[5].mxu1 }
  0xf9   :  { %v185_v57 = vadd.f32 %v184_v55, %v44_v34  ;;  %v225_v58 = vadd.f32 %v224_v56, %v44_v34 }
  0xfa   :  { %249 = vst.msk [vmem:[%s587_s3 + $0x28] sm:$0xff] %vm243_vm4, %v190_v53  ;;  %257 = vst.msk [vmem:[%s587_s3 + $0x68] sm:$0xff] %vm243_vm4, %v230_v54 }
  0xfb   :  { %248 = vst.msk [vmem:[%s587_s3 + $0x20] sm:$0xff] %vm243_vm4, %v185_v57  ;;  %256 = vst.msk [vmem:[%s587_s3 + $0x60] sm:$0xff] %vm243_vm4, %v225_v58  ;;  %v344_v59 = vpop.f32.mrb[6].mxu0  ;;  %v356_v60 = vpop.f32.mrb[6].mxu1 }
  0xfc   :  { %v200_v61 = vadd.f32 %v344_v59, %v44_v34  ;;  %v240_v62 = vadd.f32 %v356_v60, %v44_v34  ;;  %v194_v63 = vpop.f32.mrb[7].mxu0  ;;  %v234_v0 = vpop.f32.mrb[7].mxu1 }
  0xfd   :  { %v195_v1 = vadd.f32 %v194_v63, %v44_v34  ;;  %v235_v2 = vadd.f32 %v234_v0, %v44_v34 }
  0xfe   :  { %251 = vst.msk [vmem:[%s587_s3 + $0x38] sm:$0xff] %vm243_vm4, %v200_v61  ;;  %259 = vst.msk [vmem:[%s587_s3 + $0x78] sm:$0xff] %vm243_vm4, %v240_v62 }
  0xff   :  { %250 = vst.msk [vmem:[%s587_s3 + $0x30] sm:$0xff] %vm243_vm4, %v195_v1  ;;  %258 = vst.msk [vmem:[%s587_s3 + $0x70] sm:$0xff] %vm243_vm4, %v235_v2 }

</bundles_post_ra>
